<compile_context>
chip_gen: v7x
topology: tpu7x:2x2x1
jax: 0.10.0
libtpu: 0.0.40
codegen_flags: <defaults>
</compile_context>

<pallas_src>
import math
import functools

import jax
import jax.numpy as jnp
import numpy as np
from jax.experimental import pallas as pl
from jax.experimental.pallas import tpu as pltpu

MXU_DTYPE = jnp.bfloat16   # intermediates + attention MXU inputs (f32 accumulate)


def _vmem_limit_bytes():
    """Generation-gated scoped-VMEM budget: ~75% of physical, capped at 96 MiB."""
    cap = 64 * 1024 * 1024
    try:
        cap = int(getattr(pltpu.get_tpu_info(), "vmem_capacity_bytes", cap))
    except Exception:
        pass
    # v5e/v6e (128 MiB physical) -> 96 MiB; v7x (64 MiB physical) -> 48 MiB.
    return int(min((cap * 3) // 4, 96 * 1024 * 1024))


VMEM_LIMIT_BYTES = _vmem_limit_bytes()


def _pick_tile_m(M, tm_max=512):
    """Row tile for [B*S, *] slabs: as large as VMEM allows (no 2-TC halving)."""
    tm = min(tm_max, M)
    if tm % 8 != 0:          # (8,128) sublane rule: multiple of 8 or full extent
        tm = M
    return tm


def _pick_seq_tile(S, t_max):
    """Sequence tiles: lane-dense multiples of 128 when S allows, else full S."""
    if S >= 128:
        t = min(t_max, S)
        return max(128, (t // 128) * 128)
    return S


def _pick_heads_per_block(H, Hd, R, tq, tk, vmem_limit):
    """Largest head block whose (double-buffered) working set fits the budget."""
    Dk = Hd + R
    valid = [d for d in range(1, H + 1)
             if H % d == 0 and (d == H or ((d * Dk) % 128 == 0
                                           and (d * Hd) % 128 == 0))]
    smallest = min(valid)
    for hb in sorted(valid, reverse=True):
        blk = 2 * 2 * (tq * hb * Dk + tk * hb * (Dk + Hd) + tq * hb * Hd)  # bf16 x2 buf
        scratch = 4 * hb * tq * (Hd + 2)                                   # f32 m/l/acc
        if blk + scratch <= vmem_limit // 2:
            return hb
    return smallest


def _dot_nt(a, b):
    # a: [m, d], b: [n, d] -> [m, n]; contracts last dims (no transpose op).
    return jax.lax.dot_general(a, b, (((1,), (1,)), ((), ())),
                               preferred_element_type=jnp.float32)


# --------------------------- fused linear (out proj) ------------------------

def _linear_kernel(x_ref, w_ref, b_ref, o_ref):
    o_ref[...] = (
        jnp.dot(x_ref[...], w_ref[...], preferred_element_type=jnp.float32)
        + b_ref[...]
    ).astype(o_ref.dtype)


def fused_linear(x, w, b, *, tm_max=512):
    M, K = x.shape
    N = w.shape[1]
    tm = _pick_tile_m(M, tm_max)
    grid_m = pl.cdiv(M, tm)
    return pl.pallas_call(
        _linear_kernel,
        out_shape=jax.ShapeDtypeStruct((M, N), jnp.float32),
        grid=(grid_m,),
        in_specs=[
            pl.BlockSpec((tm, K), lambda i: (i, 0)),
            pl.BlockSpec((K, N), lambda i: (0, 0)),
            pl.BlockSpec((1, N), lambda i: (0, 0)),
        ],
        out_specs=pl.BlockSpec((tm, N), lambda i: (i, 0)),
        compiler_params=pltpu.CompilerParams(
            dimension_semantics=("parallel",),
            vmem_limit_bytes=VMEM_LIMIT_BYTES),
        cost_estimate=pl.CostEstimate(
            flops=2 * M * K * N,
            transcendentals=0,
            bytes_accessed=int(jnp.dtype(x.dtype).itemsize * M * K
                               + 4 * (K * N + N + M * N))),
    )(x, w, b)


# ----------------------- fused projection (all 7 linears) -------------------

def _fused_proj_kernel(x_ref, cs_ref, wx_ref, bx_ref, wq_ref, bq_ref,
                       wkv_ref, bkv_ref, q_ref, k_ref, v_ref, *,
                       kv_dim, q_dim, n_heads, head_dim, rope_dim):
    H, Hd, R = n_heads, head_dim, rope_dim
    Rh = R // 2
    Dk = Hd + R

    x = x_ref[...]
    cs = cs_ref[...]
    cos, sin = cs[:, :Rh], cs[:, Rh:]

    # Stage 1: x -> [latent_kv | latent_q | rope_key (de-interleaved e|o)]
    slab = (jnp.dot(x, wx_ref[...], preferred_element_type=jnp.float32)
            + bx_ref[...])
    lkv = slab[:, :kv_dim]
    lq = slab[:, kv_dim:kv_dim + q_dim]
    kre = slab[:, kv_dim + q_dim:kv_dim + q_dim + Rh]
    kro = slab[:, kv_dim + q_dim + Rh:]
    # Rotary for the (head-shared) rope key, done once per row-tile.
    kr_e = kre * cos - kro * sin
    kr_o = kre * sin + kro * cos

    # Stage 2a: latent_q -> per-head [up_query | rope_q even | rope_q odd]
    # (weights pre-scaled by 1/sqrt(Hd+R); rotation below preserves the scale).
    qslab = (jnp.dot(lq, wq_ref[...], preferred_element_type=jnp.float32)
             + bq_ref[...])
    # Stage 2b: latent_kv -> [up_key | up_value]
    kvslab = (jnp.dot(lkv, wkv_ref[...], preferred_element_type=jnp.float32)
              + bkv_ref[...])

    v_ref[...] = kvslab[:, H * Hd:].astype(v_ref.dtype)

    # Pack per-head [content | rotated rope] so the attention kernel issues a
    # single (Hd+R)-deep MXU matmul per head with zero rotary / concat / scale
    # work in its hot loop.  (Once per row-tile, not per kv step.)
    for h in range(H):
        base = h * Dk
        q_ref[:, base:base + Hd] = qslab[:, base:base + Hd].astype(q_ref.dtype)
        qe = qslab[:, base + Hd:base + Hd + Rh]
        qo = qslab[:, base + Hd + Rh:base + Dk]
        q_ref[:, base + Hd:base + Hd + Rh] = (qe * cos - qo * sin).astype(q_ref.dtype)
        q_ref[:, base + Hd + Rh:base + Dk] = (qe * sin + qo * cos).astype(q_ref.dtype)

        k_ref[:, base:base + Hd] = kvslab[:, h * Hd:(h + 1) * Hd].astype(k_ref.dtype)
        k_ref[:, base + Hd:base + Hd + Rh] = kr_e.astype(k_ref.dtype)
        k_ref[:, base + Hd + Rh:base + Dk] = kr_o.astype(k_ref.dtype)


def fused_projection(x, cs, wx, bx, wq, bq, wkv, bkv, *,
                     kv_dim, q_dim, n_heads, head_dim, rope_dim, tm_max=512):
    M, D = x.shape
    H, Hd, R = n_heads, head_dim, rope_dim
    Dk = Hd + R
    nx, nq, nkv = wx.shape[1], wq.shape[1], wkv.shape[1]
    tm = _pick_tile_m(M, tm_max)
    grid_m = pl.cdiv(M, tm)

    flops = 2 * M * (D * nx + q_dim * nq + kv_dim * nkv)
    out_item = jnp.dtype(MXU_DTYPE).itemsize
    bytes_accessed = int(4 * (M * (D + R) + D * nx + q_dim * nq + kv_dim * nkv)
                         + out_item * M * (2 * H * Dk + H * Hd))

    kernel = functools.partial(_fused_proj_kernel, kv_dim=kv_dim, q_dim=q_dim,
                               n_heads=H, head_dim=Hd, rope_dim=R)
    return pl.pallas_call(
        kernel,
        out_shape=(
            jax.ShapeDtypeStruct((M, H * Dk), MXU_DTYPE),   # q: [content|rot rope], scaled
            jax.ShapeDtypeStruct((M, H * Dk), MXU_DTYPE),   # k: [content|rot rope]
            jax.ShapeDtypeStruct((M, H * Hd), MXU_DTYPE),   # v
        ),
        grid=(grid_m,),
        in_specs=[
            pl.BlockSpec((tm, D), lambda i: (i, 0)),
            pl.BlockSpec((tm, R), lambda i: (i, 0)),
            pl.BlockSpec((D, nx), lambda i: (0, 0)),
            pl.BlockSpec((1, nx), lambda i: (0, 0)),
            pl.BlockSpec((q_dim, nq), lambda i: (0, 0)),
            pl.BlockSpec((1, nq), lambda i: (0, 0)),
            pl.BlockSpec((kv_dim, nkv), lambda i: (0, 0)),
            pl.BlockSpec((1, nkv), lambda i: (0, 0)),
        ],
        out_specs=(
            pl.BlockSpec((tm, H * Dk), lambda i: (i, 0)),
            pl.BlockSpec((tm, H * Dk), lambda i: (i, 0)),
            pl.BlockSpec((tm, H * Hd), lambda i: (i, 0)),
        ),
        compiler_params=pltpu.CompilerParams(
            dimension_semantics=("parallel",),
            vmem_limit_bytes=VMEM_LIMIT_BYTES),
        cost_estimate=pl.CostEstimate(
            flops=flops, transcendentals=0, bytes_accessed=bytes_accessed),
    )(x, cs, wx, bx, wq, bq, wkv, bkv)


# --------------------- flash attention (rotary pre-applied) -----------------

def _mla_attn_kernel(q_ref, k_ref, v_ref, o_ref, m_sc, l_sc, acc_sc, *,
                     heads_per_block, head_dim, rope_dim, tq, tk):
    qi = pl.program_id(2)
    ki = pl.program_id(3)
    Hh, Hd = heads_per_block, head_dim
    Dk = head_dim + rope_dim

    @pl.when(ki == 0)
    def _init():
        m_sc[...] = jnp.full_like(m_sc, -1e30)
        l_sc[...] = jnp.zeros_like(l_sc)
        acc_sc[...] = jnp.zeros_like(acc_sc)

    q_row0 = qi * tq
    k_col0 = ki * tk
    block_needed = k_col0 <= q_row0 + (tq - 1)       # intersects the causal region
    block_unmasked = (k_col0 + (tk - 1)) <= q_row0   # fully at/below the diagonal

    # NOTE: when S % tq != 0, padded query rows run the online softmax on block
    # padding; their outputs are cropped on writeback and no reduction crosses
    # rows, so this is benign.  Padded kv columns only ever appear in masked
    # (diagonal-straddling) blocks where the causal mask removes them.
    def process(masked):
        q_all = q_ref[...]     # [tq, Hh*(Hd+R)] bf16, rotated + pre-scaled
        k_all = k_ref[...]     # [tk, Hh*(Hd+R)] bf16, rotated rope packed per head
        v_all = v_ref[...]     # [tk, Hh*Hd]     bf16
        if masked:
            row = q_row0 + jax.lax.broadcasted_iota(jnp.int32, (tq, tk), 0)
            col = k_col0 + jax.lax.broadcasted_iota(jnp.int32, (tq, tk), 1)
            causal = col <= row
        for h in range(Hh):
            qh = q_all[:, h * Dk:(h + 1) * Dk]
            kh = k_all[:, h * Dk:(h + 1) * Dk]
            vh = v_all[:, h * Hd:(h + 1) * Hd]
            s = _dot_nt(qh, kh)                       # one (Hd+R)-deep MXU matmul
            if masked:
                s = jnp.where(causal, s, -1e30)
            m_prev = m_sc[h]
            m_new = jnp.maximum(m_prev, jnp.max(s, axis=-1, keepdims=True))
            alpha = jnp.exp(m_prev - m_new)
            p = jnp.exp(s - m_new)                    # unnormalized, f32
            l_sc[h] = alpha * l_sc[h] + jnp.sum(p, axis=-1, keepdims=True)
            acc_sc[h] = alpha * acc_sc[h] + jnp.dot(
                p.astype(v_all.dtype), vh, preferred_element_type=jnp.float32)
            m_sc[h] = m_new

    @pl.when(block_needed & block_unmasked)
    def _below_diag():                                # no mask / iota work
        process(masked=False)

    @pl.when(block_needed & jnp.logical_not(block_unmasked))
    def _on_diag():
        process(masked=True)

    @pl.when(ki == pl.num_programs(3) - 1)
    def _finalize():
        for h in range(Hh):
            inv_l = pl.reciprocal(l_sc[h], approx=True)   # deferred normalization (EUP)
            o_ref[:, h * Hd:(h + 1) * Hd] = (acc_sc[h] * inv_l).astype(o_ref.dtype)


def mla_attention(q, k, v, *, n_heads, head_dim, rope_dim,
                  tq_max=128, tk_max=256):
    B, S, _ = q.shape
    H, Hd, R = n_heads, head_dim, rope_dim
    Dk = Hd + R
    tq = _pick_seq_tile(S, tq_max)
    tk = _pick_seq_tile(S, tk_max)
    nq_t = pl.cdiv(S, tq)
    nk_t = pl.cdiv(S, tk)
    Hh = _pick_heads_per_block(H, Hd, R, tq, tk, VMEM_LIMIT_BYTES)
    n_hb = H // Hh

    def q_map(b, h, i, j):
        return (b, i, h)

    def kv_map(b, h, i, j):
        # Clamp to the last kv block this q tile can touch: causally-skipped
        # iterations repeat the previous block index and Pallas elides the DMA.
        last = (i * tq + tq - 1) // tk
        return (b, jnp.minimum(j, last), h)

    kernel = functools.partial(_mla_attn_kernel, heads_per_block=Hh,
                               head_dim=Hd, rope_dim=R, tq=tq, tk=tk)
    itemsize = jnp.dtype(q.dtype).itemsize
    flops = 2 * B * H * S * S * (Dk + Hd)
    transc = B * H * S * S
    bytes_accessed = int(itemsize * B * S * (2 * H * Dk + 2 * H * Hd))

    return pl.pallas_call(
        kernel,
        out_shape=jax.ShapeDtypeStruct((B, S, H * Hd), q.dtype),
        grid=(B, n_hb, nq_t, nk_t),
        in_specs=[
            pl.BlockSpec((None, tq, Hh * Dk), q_map),
            pl.BlockSpec((None, tk, Hh * Dk), kv_map),
            pl.BlockSpec((None, tk, Hh * Hd), kv_map),
        ],
        out_specs=pl.BlockSpec((None, tq, Hh * Hd), q_map),
        scratch_shapes=[
            pltpu.VMEM((Hh, tq, 1), jnp.float32),    # running max
            pltpu.VMEM((Hh, tq, 1), jnp.float32),    # running denom
            pltpu.VMEM((Hh, tq, Hd), jnp.float32),   # running accumulator
        ],
        compiler_params=pltpu.CompilerParams(
            dimension_semantics=("parallel", "parallel", "parallel", "arbitrary"),
            vmem_limit_bytes=VMEM_LIMIT_BYTES),
        cost_estimate=pl.CostEstimate(
            flops=flops, transcendentals=transc, bytes_accessed=bytes_accessed),
    )(q, k, v)


# ---------------------------- model glue (JAX) ------------------------------

def precompute_rotary(max_seq_len, dim):
    pos = jnp.arange(max_seq_len, dtype=jnp.float32)[:, None]
    div = jnp.exp(jnp.arange(0, dim, 2, dtype=jnp.float32)
                  * (-math.log(10000.0) / dim))
    ang = pos * div
    return jnp.cos(ang), jnp.sin(ang)


def prepare_fused_params(params, cfg):
    """Concatenate / permute / pre-scale nn.Linear weights into kernel layouts."""
    H, Hd, R = cfg["n_heads"], cfg["head_dim"], cfg["rope_dim"]
    scale = 1.0 / math.sqrt(Hd + R)                     # SDPA default scale
    perm = np.concatenate([np.arange(0, R, 2), np.arange(1, R, 2)])  # de-interleave

    w_dkv, b_dkv = params["down_kv"]
    w_dq, b_dq = params["down_query"]
    w_rk, b_rk = params["rope_key"]
    w_rq, b_rq = params["rope_query"]
    w_uq, b_uq = params["up_query"]
    w_uk, b_uk = params["up_key"]
    w_uv, b_uv = params["up_value"]

    # stage 1: x -> [latent_kv | latent_q | rope_key(e|o)]
    wx = jnp.concatenate([w_dkv, w_dq, w_rk[:, perm]], axis=1)
    bx = jnp.concatenate([b_dkv, b_dq, b_rk[:, perm]], axis=1)

    # stage 2a: latent_q -> per-head [up_query | rope_q even | rope_q odd],
    # with the 1/sqrt(Hd+R) softmax scale folded into weights AND bias.
    qw, qb = [], []
    for h in range(H):
        qw.append(w_uq[:, h * Hd:(h + 1) * Hd] * scale)
        qw.append(w_rq[:, h * R:(h + 1) * R][:, perm] * scale)
        qb.append(b_uq[:, h * Hd:(h + 1) * Hd] * scale)
        qb.append(b_rq[:, h * R:(h + 1) * R][:, perm] * scale)
    wq = jnp.concatenate(qw, axis=1)
    bq = jnp.concatenate(qb, axis=1)

    # stage 2b: latent_kv -> [up_key | up_value]
    wkv = jnp.concatenate([w_uk, w_uv], axis=1)
    bkv = jnp.concatenate([b_uk, b_uv], axis=1)

    return dict(wx=wx, bx=bx, wq=wq, bq=bq, wkv=wkv, bkv=bkv,
                out=params["out"],
                kv_dim=int(w_dkv.shape[1]), q_dim=int(w_dq.shape[1]))


def mla_forward(x, fused, cfg):
    B, S, D = x.shape
    H, Hd, R = cfg["n_heads"], cfg["head_dim"], cfg["rope_dim"]
    # The PyTorch forward computes cos/sin for head_dim and applies them to
    # rope_dim-sized vectors; only self-consistent when rope_dim == head_dim.
    assert R == Hd  # TODO(synk): partial-rotary (rope_dim < head_dim) not supported.

    x2 = x.reshape(B * S, D)
    cs = jnp.concatenate([cfg["cos"][:S, :R // 2], cfg["sin"][:S, :R // 2]],
                         axis=-1)                 # [S, R] = [cos | sin]
    cs_rows = jnp.tile(cs, (B, 1))                # [B*S, R]; position = row % S

    q_flat, k_flat, v_flat = fused_projection(
        x2, cs_rows, fused["wx"], fused["bx"], fused["wq"], fused["bq"],
        fused["wkv"], fused["bkv"],
        kv_dim=fused["kv_dim"], q_dim=fused["q_dim"],
        n_heads=H, head_dim=Hd, rope_dim=R)

    q = q_flat.reshape(B, S, H * (Hd + R))        # pure reshapes — no transposes
    k = k_flat.reshape(B, S, H * (Hd + R))
    v = v_flat.reshape(B, S, H * Hd)

    o = mla_attention(q, k, v, n_heads=H, head_dim=Hd, rope_dim=R)
    out = fused_linear(o.reshape(B * S, H * Hd), *fused["out"])
    return out.reshape(B, S, D)


# ------------------------- pure-JAX reference check -------------------------

def mla_reference(x, params, cfg):
    B, S, D = x.shape
    H, Hd, R = cfg["n_heads"], cfg["head_dim"], cfg["rope_dim"]
    hi = jax.lax.Precision.HIGHEST

    def lin(t, wb):
        w, b = wb
        return jnp.dot(t, w, precision=hi) + b[0]

    latent_kv = lin(x, params["down_kv"])
    latent_q = lin(x, params["down_query"])
    rope_k = lin(x, params["rope_key"])
    rope_q = lin(latent_q, params["rope_query"]).reshape(B, S, H, R)
    rope_k = jnp.broadcast_to(rope_k[:, :, None, :], (B, S, H, R))
    cos = cfg["cos"][:S, :R // 2]
    sin = cfg["sin"][:S, :R // 2]

    def rot(t):
        te, to = t[..., 0::2], t[..., 1::2]
        c, s = cos[None, :, None, :], sin[None, :, None, :]
        return jnp.stack([te * c - to * s, te * s + to * c], axis=-1).reshape(B, S, H, R)

    rope_q = rot(rope_q)
    rope_k = rot(rope_k)
    up_q = lin(latent_q, params["up_query"]).reshape(B, S, H, Hd)
    up_k = lin(latent_kv, params["up_key"]).reshape(B, S, H, Hd)
    up_v = lin(latent_kv, params["up_value"]).reshape(B, S, H, Hd)
    q = jnp.concatenate([up_q, rope_q], -1).transpose(0, 2, 1, 3)
    k = jnp.concatenate([up_k, rope_k], -1).transpose(0, 2, 1, 3)
    v = up_v.transpose(0, 2, 1, 3)
    scale = 1.0 / math.sqrt(Hd + R)
    s = jnp.einsum("bhqd,bhkd->bhqk", q, k, precision=hi) * scale
    mask = jnp.tril(jnp.ones((S, S), bool))
    s = jnp.where(mask[None, None], s, -jnp.inf)
    p = jax.nn.softmax(s, axis=-1)
    o = jnp.einsum("bhqk,bhkd->bhqd", p, v, precision=hi)
    o = o.transpose(0, 2, 1, 3).reshape(B, S, D)
    return lin(o, params["out"])


# ----------------------------------- main -----------------------------------

if __name__ == "__main__":
    d_model, n_heads = 32, 4
    head_dim = d_model // n_heads          # 8
    kv_dim, q_dim = 16, 16
    rope_dim = head_dim                    # 8 (required for valid rotary in the ref module)
    max_seq_len = 64
    B, S = 2, 8

    key = jax.random.PRNGKey(0)
    keys = jax.random.split(key, 9)

    def init_linear(k, fan_in, fan_out):
        kw, kb = jax.random.split(k)
        bound = 1.0 / math.sqrt(fan_in)
        w = jax.random.uniform(kw, (fan_in, fan_out), jnp.float32, -bound, bound)
        b = jax.random.uniform(kb, (1, fan_out), jnp.float32, -bound, bound)
        return w, b

    params = {
        "rope_key":   init_linear(keys[0], d_model, rope_dim),
        "rope_query": init_linear(keys[1], q_dim, rope_dim * n_heads),
        "down_kv":    init_linear(keys[2], d_model, kv_dim),
        "down_query": init_linear(keys[3], d_model, q_dim),
        "up_key":     init_linear(keys[4], kv_dim, d_model),
        "up_value":   init_linear(keys[5], kv_dim, d_model),
        "up_query":   init_linear(keys[6], q_dim, d_model),
        "out":        init_linear(keys[7], d_model, d_model),
    }
    cos, sin = precompute_rotary(max_seq_len, head_dim)
    cfg = dict(n_heads=n_heads, head_dim=head_dim, rope_dim=rope_dim, cos=cos, sin=sin)

    fused = prepare_fused_params(params, cfg)
    x = jax.random.normal(keys[8], (B, S, d_model), jnp.float32)

    out = mla_forward(x, fused, cfg)
    out = jax.block_until_ready(out)

    ref = mla_reference(x, params, cfg)
    assert out.shape == (B, S, d_model)
    # bf16 MXU inputs bound the relative error at ~2^-8; accumulation is f32.
    np.testing.assert_allclose(np.asarray(out), np.asarray(ref), rtol=2e-2, atol=2e-2)
    print("KERNEL_OK")
</pallas_src>

<mosaic_0001>
module attributes {stable_mosaic.version = 11 : i64} {
  func.func @_fused_proj_kernel(%arg0: i32, %arg1: memref<16x32xf32, #tpu.memory_space<vmem>>, %arg2: memref<16x8xf32, #tpu.memory_space<vmem>>, %arg3: memref<32x40xf32, #tpu.memory_space<vmem>>, %arg4: memref<1x40xf32, #tpu.memory_space<vmem>>, %arg5: memref<16x64xf32, #tpu.memory_space<vmem>>, %arg6: memref<1x64xf32, #tpu.memory_space<vmem>>, %arg7: memref<16x64xf32, #tpu.memory_space<vmem>>, %arg8: memref<1x64xf32, #tpu.memory_space<vmem>>, %arg9: memref<16x64xbf16, #tpu.memory_space<vmem>>, %arg10: memref<16x64xbf16, #tpu.memory_space<vmem>>, %arg11: memref<16x32xbf16, #tpu.memory_space<vmem>>) attributes {dimension_semantics = [#tpu.dimension_semantics<parallel>], iteration_bounds = array<i64: 1>, scalar_prefetch = 0 : i64, scratch_operands = 0 : i64, tpu.core_type = #tpu.core_type<tc>, window_params = [{transform_indices = @transform_0, window_bounds = array<i64: 16, 32>}, {transform_indices = @transform_1, window_bounds = array<i64: 16, 8>}, {pipeline_mode = #tpu.pipeline_mode<synchronous>, transform_indices = @transform_2, window_bounds = array<i64: 32, 40>}, {pipeline_mode = #tpu.pipeline_mode<synchronous>, transform_indices = @transform_3, window_bounds = array<i64: 1, 40>}, {pipeline_mode = #tpu.pipeline_mode<synchronous>, transform_indices = @transform_4, window_bounds = array<i64: 16, 64>}, {pipeline_mode = #tpu.pipeline_mode<synchronous>, transform_indices = @transform_5, window_bounds = array<i64: 1, 64>}, {pipeline_mode = #tpu.pipeline_mode<synchronous>, transform_indices = @transform_6, window_bounds = array<i64: 16, 64>}, {pipeline_mode = #tpu.pipeline_mode<synchronous>, transform_indices = @transform_7, window_bounds = array<i64: 1, 64>}, {transform_indices = @transform_8, window_bounds = array<i64: 16, 64>}, {transform_indices = @transform_9, window_bounds = array<i64: 16, 64>}, {transform_indices = @transform_10, window_bounds = array<i64: 16, 32>}]} {
    %c0 = arith.constant 0 : index
    %c0_0 = arith.constant 0 : index
    %0 = vector.load %arg1[%c0, %c0_0] : memref<16x32xf32, #tpu.memory_space<vmem>>, vector<16x32xf32>
    %c0_1 = arith.constant 0 : index
    %c0_2 = arith.constant 0 : index
    %1 = vector.load %arg2[%c0_1, %c0_2] : memref<16x8xf32, #tpu.memory_space<vmem>>, vector<16x8xf32>
    %2 = vector.extract_strided_slice %1 {offsets = [0, 0], sizes = [16, 4], strides = [1, 1]} : vector<16x8xf32> to vector<16x4xf32>
    %3 = vector.extract_strided_slice %1 {offsets = [0, 4], sizes = [16, 4], strides = [1, 1]} : vector<16x8xf32> to vector<16x4xf32>
    %c0_3 = arith.constant 0 : index
    %c0_4 = arith.constant 0 : index
    %4 = vector.load %arg3[%c0_3, %c0_4] : memref<32x40xf32, #tpu.memory_space<vmem>>, vector<32x40xf32>
    %cst = arith.constant dense<0.000000e+00> : vector<16x40xf32>
    %5 = tpu.matmul %0, %4, %cst {dimension_numbers = #tpu.dot_dimension_numbers<[1], [0], [0], [1], [0, 0, 1, 1], [], []>} : vector<16x32xf32>, vector<32x40xf32>, vector<16x40xf32> -> vector<16x40xf32>
    %c0_5 = arith.constant 0 : index
    %c0_6 = arith.constant 0 : index
    %6 = vector.load %arg4[%c0_5, %c0_6] : memref<1x40xf32, #tpu.memory_space<vmem>>, vector<1x40xf32>
    %7 = vector.broadcast %6 : vector<1x40xf32> to vector<16x40xf32>
    %8 = arith.addf %5, %7 : vector<16x40xf32>
    %9 = vector.extract_strided_slice %8 {offsets = [0, 0], sizes = [16, 16], strides = [1, 1]} : vector<16x40xf32> to vector<16x16xf32>
    %10 = vector.extract_strided_slice %8 {offsets = [0, 16], sizes = [16, 16], strides = [1, 1]} : vector<16x40xf32> to vector<16x16xf32>
    %11 = vector.extract_strided_slice %8 {offsets = [0, 32], sizes = [16, 4], strides = [1, 1]} : vector<16x40xf32> to vector<16x4xf32>
    %12 = vector.extract_strided_slice %8 {offsets = [0, 36], sizes = [16, 4], strides = [1, 1]} : vector<16x40xf32> to vector<16x4xf32>
    %13 = arith.mulf %11, %2 : vector<16x4xf32>
    %14 = arith.mulf %12, %3 : vector<16x4xf32>
    %15 = arith.subf %13, %14 : vector<16x4xf32>
    %16 = arith.mulf %11, %3 : vector<16x4xf32>
    %17 = arith.mulf %12, %2 : vector<16x4xf32>
    %18 = arith.addf %16, %17 : vector<16x4xf32>
    %c0_7 = arith.constant 0 : index
    %c0_8 = arith.constant 0 : index
    %19 = vector.load %arg5[%c0_7, %c0_8] : memref<16x64xf32, #tpu.memory_space<vmem>>, vector<16x64xf32>
    %cst_9 = arith.constant dense<0.000000e+00> : vector<16x64xf32>
    %20 = tpu.matmul %10, %19, %cst_9 {dimension_numbers = #tpu.dot_dimension_numbers<[1], [0], [0], [1], [0, 0, 1, 1], [], []>} : vector<16x16xf32>, vector<16x64xf32>, vector<16x64xf32> -> vector<16x64xf32>
    %c0_10 = arith.constant 0 : index
    %c0_11 = arith.constant 0 : index
    %21 = vector.load %arg6[%c0_10, %c0_11] : memref<1x64xf32, #tpu.memory_space<vmem>>, vector<1x64xf32>
    %22 = vector.broadcast %21 : vector<1x64xf32> to vector<16x64xf32>
    %23 = arith.addf %20, %22 : vector<16x64xf32>
    %c0_12 = arith.constant 0 : index
    %c0_13 = arith.constant 0 : index
    %24 = vector.load %arg7[%c0_12, %c0_13] : memref<16x64xf32, #tpu.memory_space<vmem>>, vector<16x64xf32>
    %cst_14 = arith.constant dense<0.000000e+00> : vector<16x64xf32>
    %25 = tpu.matmul %9, %24, %cst_14 {dimension_numbers = #tpu.dot_dimension_numbers<[1], [0], [0], [1], [0, 0, 1, 1], [], []>} : vector<16x16xf32>, vector<16x64xf32>, vector<16x64xf32> -> vector<16x64xf32>
    %c0_15 = arith.constant 0 : index
    %c0_16 = arith.constant 0 : index
    %26 = vector.load %arg8[%c0_15, %c0_16] : memref<1x64xf32, #tpu.memory_space<vmem>>, vector<1x64xf32>
    %27 = vector.broadcast %26 : vector<1x64xf32> to vector<16x64xf32>
    %28 = arith.addf %25, %27 : vector<16x64xf32>
    %29 = vector.extract_strided_slice %28 {offsets = [0, 32], sizes = [16, 32], strides = [1, 1]} : vector<16x64xf32> to vector<16x32xf32>
    %30 = arith.truncf %29 : vector<16x32xf32> to vector<16x32xbf16>
    %c0_17 = arith.constant 0 : index
    %c0_18 = arith.constant 0 : index
    %31 = vector.load %arg11[%c0_17, %c0_18] : memref<16x32xbf16, #tpu.memory_space<vmem>>, vector<16x32xbf16>
    tpu.vector_store %arg11[%c0_17, %c0_18], %30 {strides = array<i32>} : memref<16x32xbf16, #tpu.memory_space<vmem>>, vector<16x32xbf16>,
    %32 = vector.extract_strided_slice %23 {offsets = [0, 0], sizes = [16, 8], strides = [1, 1]} : vector<16x64xf32> to vector<16x8xf32>
    %33 = arith.truncf %32 : vector<16x8xf32> to vector<16x8xbf16>
    %c0_19 = arith.constant 0 : index
    %c0_20 = arith.constant 0 : index
    %34 = vector.load %arg9[%c0_19, %c0_20] : memref<16x64xbf16, #tpu.memory_space<vmem>>, vector<16x8xbf16>
    tpu.vector_store %arg9[%c0_19, %c0_20], %33 {strides = array<i32>} : memref<16x64xbf16, #tpu.memory_space<vmem>>, vector<16x8xbf16>,
    %35 = vector.extract_strided_slice %23 {offsets = [0, 8], sizes = [16, 4], strides = [1, 1]} : vector<16x64xf32> to vector<16x4xf32>
    %36 = vector.extract_strided_slice %23 {offsets = [0, 12], sizes = [16, 4], strides = [1, 1]} : vector<16x64xf32> to vector<16x4xf32>
    %37 = arith.mulf %35, %2 : vector<16x4xf32>
    %38 = arith.mulf %36, %3 : vector<16x4xf32>
    %39 = arith.subf %37, %38 : vector<16x4xf32>
    %40 = arith.truncf %39 : vector<16x4xf32> to vector<16x4xbf16>
    %c0_21 = arith.constant 0 : index
    %c8 = arith.constant 8 : index
    %41 = vector.load %arg9[%c0_21, %c8] : memref<16x64xbf16, #tpu.memory_space<vmem>>, vector<16x4xbf16>
    tpu.vector_store %arg9[%c0_21, %c8], %40 {strides = array<i32>} : memref<16x64xbf16, #tpu.memory_space<vmem>>, vector<16x4xbf16>,
    %42 = arith.mulf %35, %3 : vector<16x4xf32>
    %43 = arith.mulf %36, %2 : vector<16x4xf32>
    %44 = arith.addf %42, %43 : vector<16x4xf32>
    %45 = arith.truncf %44 : vector<16x4xf32> to vector<16x4xbf16>
    %c0_22 = arith.constant 0 : index
    %c12 = arith.constant 12 : index
    %46 = vector.load %arg9[%c0_22, %c12] : memref<16x64xbf16, #tpu.memory_space<vmem>>, vector<16x4xbf16>
    tpu.vector_store %arg9[%c0_22, %c12], %45 {strides = array<i32>} : memref<16x64xbf16, #tpu.memory_space<vmem>>, vector<16x4xbf16>,
    %47 = vector.extract_strided_slice %28 {offsets = [0, 0], sizes = [16, 8], strides = [1, 1]} : vector<16x64xf32> to vector<16x8xf32>
    %48 = arith.truncf %47 : vector<16x8xf32> to vector<16x8xbf16>
    %c0_23 = arith.constant 0 : index
    %c0_24 = arith.constant 0 : index
    %49 = vector.load %arg10[%c0_23, %c0_24] : memref<16x64xbf16, #tpu.memory_space<vmem>>, vector<16x8xbf16>
    tpu.vector_store %arg10[%c0_23, %c0_24], %48 {strides = array<i32>} : memref<16x64xbf16, #tpu.memory_space<vmem>>, vector<16x8xbf16>,
    %50 = arith.truncf %15 : vector<16x4xf32> to vector<16x4xbf16>
    %c0_25 = arith.constant 0 : index
    %c8_26 = arith.constant 8 : index
    %51 = vector.load %arg10[%c0_25, %c8_26] : memref<16x64xbf16, #tpu.memory_space<vmem>>, vector<16x4xbf16>
    tpu.vector_store %arg10[%c0_25, %c8_26], %50 {strides = array<i32>} : memref<16x64xbf16, #tpu.memory_space<vmem>>, vector<16x4xbf16>,
    %52 = arith.truncf %18 : vector<16x4xf32> to vector<16x4xbf16>
    %c0_27 = arith.constant 0 : index
    %c12_28 = arith.constant 12 : index
    %53 = vector.load %arg10[%c0_27, %c12_28] : memref<16x64xbf16, #tpu.memory_space<vmem>>, vector<16x4xbf16>
    tpu.vector_store %arg10[%c0_27, %c12_28], %52 {strides = array<i32>} : memref<16x64xbf16, #tpu.memory_space<vmem>>, vector<16x4xbf16>,
    %54 = vector.extract_strided_slice %23 {offsets = [0, 16], sizes = [16, 8], strides = [1, 1]} : vector<16x64xf32> to vector<16x8xf32>
    %55 = arith.truncf %54 : vector<16x8xf32> to vector<16x8xbf16>
    %c0_29 = arith.constant 0 : index
    %c16 = arith.constant 16 : index
    %56 = vector.load %arg9[%c0_29, %c16] : memref<16x64xbf16, #tpu.memory_space<vmem>>, vector<16x8xbf16>
    tpu.vector_store %arg9[%c0_29, %c16], %55 {strides = array<i32>} : memref<16x64xbf16, #tpu.memory_space<vmem>>, vector<16x8xbf16>,
    %57 = vector.extract_strided_slice %23 {offsets = [0, 24], sizes = [16, 4], strides = [1, 1]} : vector<16x64xf32> to vector<16x4xf32>
    %58 = vector.extract_strided_slice %23 {offsets = [0, 28], sizes = [16, 4], strides = [1, 1]} : vector<16x64xf32> to vector<16x4xf32>
    %59 = arith.mulf %57, %2 : vector<16x4xf32>
    %60 = arith.mulf %58, %3 : vector<16x4xf32>
    %61 = arith.subf %59, %60 : vector<16x4xf32>
    %62 = arith.truncf %61 : vector<16x4xf32> to vector<16x4xbf16>
    %c0_30 = arith.constant 0 : index
    %c24 = arith.constant 24 : index
    %63 = vector.load %arg9[%c0_30, %c24] : memref<16x64xbf16, #tpu.memory_space<vmem>>, vector<16x4xbf16>
    tpu.vector_store %arg9[%c0_30, %c24], %62 {strides = array<i32>} : memref<16x64xbf16, #tpu.memory_space<vmem>>, vector<16x4xbf16>,
    %64 = arith.mulf %57, %3 : vector<16x4xf32>
    %65 = arith.mulf %58, %2 : vector<16x4xf32>
    %66 = arith.addf %64, %65 : vector<16x4xf32>
    %67 = arith.truncf %66 : vector<16x4xf32> to vector<16x4xbf16>
    %c0_31 = arith.constant 0 : index
    %c28 = arith.constant 28 : index
    %68 = vector.load %arg9[%c0_31, %c28] : memref<16x64xbf16, #tpu.memory_space<vmem>>, vector<16x4xbf16>
    tpu.vector_store %arg9[%c0_31, %c28], %67 {strides = array<i32>} : memref<16x64xbf16, #tpu.memory_space<vmem>>, vector<16x4xbf16>,
    %69 = vector.extract_strided_slice %28 {offsets = [0, 8], sizes = [16, 8], strides = [1, 1]} : vector<16x64xf32> to vector<16x8xf32>
    %70 = arith.truncf %69 : vector<16x8xf32> to vector<16x8xbf16>
    %c0_32 = arith.constant 0 : index
    %c16_33 = arith.constant 16 : index
    %71 = vector.load %arg10[%c0_32, %c16_33] : memref<16x64xbf16, #tpu.memory_space<vmem>>, vector<16x8xbf16>
    tpu.vector_store %arg10[%c0_32, %c16_33], %70 {strides = array<i32>} : memref<16x64xbf16, #tpu.memory_space<vmem>>, vector<16x8xbf16>,
    %72 = arith.truncf %15 : vector<16x4xf32> to vector<16x4xbf16>
    %c0_34 = arith.constant 0 : index
    %c24_35 = arith.constant 24 : index
    %73 = vector.load %arg10[%c0_34, %c24_35] : memref<16x64xbf16, #tpu.memory_space<vmem>>, vector<16x4xbf16>
    tpu.vector_store %arg10[%c0_34, %c24_35], %72 {strides = array<i32>} : memref<16x64xbf16, #tpu.memory_space<vmem>>, vector<16x4xbf16>,
    %74 = arith.truncf %18 : vector<16x4xf32> to vector<16x4xbf16>
    %c0_36 = arith.constant 0 : index
    %c28_37 = arith.constant 28 : index
    %75 = vector.load %arg10[%c0_36, %c28_37] : memref<16x64xbf16, #tpu.memory_space<vmem>>, vector<16x4xbf16>
    tpu.vector_store %arg10[%c0_36, %c28_37], %74 {strides = array<i32>} : memref<16x64xbf16, #tpu.memory_space<vmem>>, vector<16x4xbf16>,
    %76 = vector.extract_strided_slice %23 {offsets = [0, 32], sizes = [16, 8], strides = [1, 1]} : vector<16x64xf32> to vector<16x8xf32>
    %77 = arith.truncf %76 : vector<16x8xf32> to vector<16x8xbf16>
    %c0_38 = arith.constant 0 : index
    %c32 = arith.constant 32 : index
    %78 = vector.load %arg9[%c0_38, %c32] : memref<16x64xbf16, #tpu.memory_space<vmem>>, vector<16x8xbf16>
    tpu.vector_store %arg9[%c0_38, %c32], %77 {strides = array<i32>} : memref<16x64xbf16, #tpu.memory_space<vmem>>, vector<16x8xbf16>,
    %79 = vector.extract_strided_slice %23 {offsets = [0, 40], sizes = [16, 4], strides = [1, 1]} : vector<16x64xf32> to vector<16x4xf32>
    %80 = vector.extract_strided_slice %23 {offsets = [0, 44], sizes = [16, 4], strides = [1, 1]} : vector<16x64xf32> to vector<16x4xf32>
    %81 = arith.mulf %79, %2 : vector<16x4xf32>
    %82 = arith.mulf %80, %3 : vector<16x4xf32>
    %83 = arith.subf %81, %82 : vector<16x4xf32>
    %84 = arith.truncf %83 : vector<16x4xf32> to vector<16x4xbf16>
    %c0_39 = arith.constant 0 : index
    %c40 = arith.constant 40 : index
    %85 = vector.load %arg9[%c0_39, %c40] : memref<16x64xbf16, #tpu.memory_space<vmem>>, vector<16x4xbf16>
    tpu.vector_store %arg9[%c0_39, %c40], %84 {strides = array<i32>} : memref<16x64xbf16, #tpu.memory_space<vmem>>, vector<16x4xbf16>,
    %86 = arith.mulf %79, %3 : vector<16x4xf32>
    %87 = arith.mulf %80, %2 : vector<16x4xf32>
    %88 = arith.addf %86, %87 : vector<16x4xf32>
    %89 = arith.truncf %88 : vector<16x4xf32> to vector<16x4xbf16>
    %c0_40 = arith.constant 0 : index
    %c44 = arith.constant 44 : index
    %90 = vector.load %arg9[%c0_40, %c44] : memref<16x64xbf16, #tpu.memory_space<vmem>>, vector<16x4xbf16>
    tpu.vector_store %arg9[%c0_40, %c44], %89 {strides = array<i32>} : memref<16x64xbf16, #tpu.memory_space<vmem>>, vector<16x4xbf16>,
    %91 = vector.extract_strided_slice %28 {offsets = [0, 16], sizes = [16, 8], strides = [1, 1]} : vector<16x64xf32> to vector<16x8xf32>
    %92 = arith.truncf %91 : vector<16x8xf32> to vector<16x8xbf16>
    %c0_41 = arith.constant 0 : index
    %c32_42 = arith.constant 32 : index
    %93 = vector.load %arg10[%c0_41, %c32_42] : memref<16x64xbf16, #tpu.memory_space<vmem>>, vector<16x8xbf16>
    tpu.vector_store %arg10[%c0_41, %c32_42], %92 {strides = array<i32>} : memref<16x64xbf16, #tpu.memory_space<vmem>>, vector<16x8xbf16>,
    %94 = arith.truncf %15 : vector<16x4xf32> to vector<16x4xbf16>
    %c0_43 = arith.constant 0 : index
    %c40_44 = arith.constant 40 : index
    %95 = vector.load %arg10[%c0_43, %c40_44] : memref<16x64xbf16, #tpu.memory_space<vmem>>, vector<16x4xbf16>
    tpu.vector_store %arg10[%c0_43, %c40_44], %94 {strides = array<i32>} : memref<16x64xbf16, #tpu.memory_space<vmem>>, vector<16x4xbf16>,
    %96 = arith.truncf %18 : vector<16x4xf32> to vector<16x4xbf16>
    %c0_45 = arith.constant 0 : index
    %c44_46 = arith.constant 44 : index
    %97 = vector.load %arg10[%c0_45, %c44_46] : memref<16x64xbf16, #tpu.memory_space<vmem>>, vector<16x4xbf16>
    tpu.vector_store %arg10[%c0_45, %c44_46], %96 {strides = array<i32>} : memref<16x64xbf16, #tpu.memory_space<vmem>>, vector<16x4xbf16>,
    %98 = vector.extract_strided_slice %23 {offsets = [0, 48], sizes = [16, 8], strides = [1, 1]} : vector<16x64xf32> to vector<16x8xf32>
    %99 = arith.truncf %98 : vector<16x8xf32> to vector<16x8xbf16>
    %c0_47 = arith.constant 0 : index
    %c48 = arith.constant 48 : index
    %100 = vector.load %arg9[%c0_47, %c48] : memref<16x64xbf16, #tpu.memory_space<vmem>>, vector<16x8xbf16>
    tpu.vector_store %arg9[%c0_47, %c48], %99 {strides = array<i32>} : memref<16x64xbf16, #tpu.memory_space<vmem>>, vector<16x8xbf16>,
    %101 = vector.extract_strided_slice %23 {offsets = [0, 56], sizes = [16, 4], strides = [1, 1]} : vector<16x64xf32> to vector<16x4xf32>
    %102 = vector.extract_strided_slice %23 {offsets = [0, 60], sizes = [16, 4], strides = [1, 1]} : vector<16x64xf32> to vector<16x4xf32>
    %103 = arith.mulf %101, %2 : vector<16x4xf32>
    %104 = arith.mulf %102, %3 : vector<16x4xf32>
    %105 = arith.subf %103, %104 : vector<16x4xf32>
    %106 = arith.truncf %105 : vector<16x4xf32> to vector<16x4xbf16>
    %c0_48 = arith.constant 0 : index
    %c56 = arith.constant 56 : index
    %107 = vector.load %arg9[%c0_48, %c56] : memref<16x64xbf16, #tpu.memory_space<vmem>>, vector<16x4xbf16>
    tpu.vector_store %arg9[%c0_48, %c56], %106 {strides = array<i32>} : memref<16x64xbf16, #tpu.memory_space<vmem>>, vector<16x4xbf16>,
    %108 = arith.mulf %101, %3 : vector<16x4xf32>
    %109 = arith.mulf %102, %2 : vector<16x4xf32>
    %110 = arith.addf %108, %109 : vector<16x4xf32>
    %111 = arith.truncf %110 : vector<16x4xf32> to vector<16x4xbf16>
    %c0_49 = arith.constant 0 : index
    %c60 = arith.constant 60 : index
    %112 = vector.load %arg9[%c0_49, %c60] : memref<16x64xbf16, #tpu.memory_space<vmem>>, vector<16x4xbf16>
    tpu.vector_store %arg9[%c0_49, %c60], %111 {strides = array<i32>} : memref<16x64xbf16, #tpu.memory_space<vmem>>, vector<16x4xbf16>,
    %113 = vector.extract_strided_slice %28 {offsets = [0, 24], sizes = [16, 8], strides = [1, 1]} : vector<16x64xf32> to vector<16x8xf32>
    %114 = arith.truncf %113 : vector<16x8xf32> to vector<16x8xbf16>
    %c0_50 = arith.constant 0 : index
    %c48_51 = arith.constant 48 : index
    %115 = vector.load %arg10[%c0_50, %c48_51] : memref<16x64xbf16, #tpu.memory_space<vmem>>, vector<16x8xbf16>
    tpu.vector_store %arg10[%c0_50, %c48_51], %114 {strides = array<i32>} : memref<16x64xbf16, #tpu.memory_space<vmem>>, vector<16x8xbf16>,
    %116 = arith.truncf %15 : vector<16x4xf32> to vector<16x4xbf16>
    %c0_52 = arith.constant 0 : index
    %c56_53 = arith.constant 56 : index
    %117 = vector.load %arg10[%c0_52, %c56_53] : memref<16x64xbf16, #tpu.memory_space<vmem>>, vector<16x4xbf16>
    tpu.vector_store %arg10[%c0_52, %c56_53], %116 {strides = array<i32>} : memref<16x64xbf16, #tpu.memory_space<vmem>>, vector<16x4xbf16>,
    %118 = arith.truncf %18 : vector<16x4xf32> to vector<16x4xbf16>
    %c0_54 = arith.constant 0 : index
    %c60_55 = arith.constant 60 : index
    %119 = vector.load %arg10[%c0_54, %c60_55] : memref<16x64xbf16, #tpu.memory_space<vmem>>, vector<16x4xbf16>
    tpu.vector_store %arg10[%c0_54, %c60_55], %118 {strides = array<i32>} : memref<16x64xbf16, #tpu.memory_space<vmem>>, vector<16x4xbf16>,
    return
  }
  func.func @transform_0(%arg0: i32) -> (i32, i32) {
    %c0_i32 = arith.constant 0 : i32
    %c0_i32_0 = arith.constant 0 : i32
    return %arg0, %c0_i32 : i32, i32
  }
  func.func @transform_1(%arg0: i32) -> (i32, i32) {
    %c0_i32 = arith.constant 0 : i32
    %c0_i32_0 = arith.constant 0 : i32
    return %arg0, %c0_i32 : i32, i32
  }
  func.func @transform_2(%arg0: i32) -> (i32, i32) {
    %c0_i32 = arith.constant 0 : i32
    %c0_i32_0 = arith.constant 0 : i32
    %c0_i32_1 = arith.constant 0 : i32
    return %c0_i32, %c0_i32_0 : i32, i32
  }
  func.func @transform_3(%arg0: i32) -> (i32, i32) {
    %c0_i32 = arith.constant 0 : i32
    %c0_i32_0 = arith.constant 0 : i32
    %c0_i32_1 = arith.constant 0 : i32
    return %c0_i32, %c0_i32_0 : i32, i32
  }
  func.func @transform_4(%arg0: i32) -> (i32, i32) {
    %c0_i32 = arith.constant 0 : i32
    %c0_i32_0 = arith.constant 0 : i32
    %c0_i32_1 = arith.constant 0 : i32
    return %c0_i32, %c0_i32_0 : i32, i32
  }
  func.func @transform_5(%arg0: i32) -> (i32, i32) {
    %c0_i32 = arith.constant 0 : i32
    %c0_i32_0 = arith.constant 0 : i32
    %c0_i32_1 = arith.constant 0 : i32
    return %c0_i32, %c0_i32_0 : i32, i32
  }
  func.func @transform_6(%arg0: i32) -> (i32, i32) {
    %c0_i32 = arith.constant 0 : i32
    %c0_i32_0 = arith.constant 0 : i32
    %c0_i32_1 = arith.constant 0 : i32
    return %c0_i32, %c0_i32_0 : i32, i32
  }
  func.func @transform_7(%arg0: i32) -> (i32, i32) {
    %c0_i32 = arith.constant 0 : i32
    %c0_i32_0 = arith.constant 0 : i32
    %c0_i32_1 = arith.constant 0 : i32
    return %c0_i32, %c0_i32_0 : i32, i32
  }
  func.func @transform_8(%arg0: i32) -> (i32, i32) {
    %c0_i32 = arith.constant 0 : i32
    %c0_i32_0 = arith.constant 0 : i32
    return %arg0, %c0_i32 : i32, i32
  }
  func.func @transform_9(%arg0: i32) -> (i32, i32) {
    %c0_i32 = arith.constant 0 : i32
    %c0_i32_0 = arith.constant 0 : i32
    return %arg0, %c0_i32 : i32, i32
  }
  func.func @transform_10(%arg0: i32) -> (i32, i32) {
    %c0_i32 = arith.constant 0 : i32
    %c0_i32_0 = arith.constant 0 : i32
    return %arg0, %c0_i32 : i32, i32
  }
}

</mosaic_0001>

<bundles_post_ra>
// kernel: tpu_custom_call.1
= control target key start
LH: loop header
LB: loop body
LE: loop exit
PB: predicated region body
PF: predicated region fallthrough
CT: control target
= control target key end

     0   :  { %16 = vsyncpa [#allocation3], 0  ;;  %s1611_s0 = inlined_call_operand.vmem [shape: f32[16,32], index: 0, kind: input, shape index: {}]   ;;  %s1612_s1 = inlined_call_operand.vmem [shape: f32[16,8], index: 1, kind: input, shape index: {}]   ;;  %s1613_s2 = inlined_call_operand.hbm [shape: f32[32,40], index: 2, kind: input, shape index: {}]   ;;  %s1614_s3 = inlined_call_operand.vmem [shape: f32[1,40], index: 3, kind: input, shape index: {}]   ;;  %s1615_s4 = inlined_call_operand.vmem [shape: f32[16,64], index: 4, kind: input, shape index: {}]   ;;  %s1616_s5 = inlined_call_operand.vmem [shape: f32[1,64], index: 5, kind: input, shape index: {}]   ;;  %s1617_s6 = inlined_call_operand.hbm [shape: f32[16,64], index: 6, kind: input, shape index: {}]   ;;  %s1618_s7 = inlined_call_operand.vmem [shape: f32[1,64], index: 7, kind: input, shape index: {}]   ;;  %s1619_s8 = inlined_call_operand.hbm [shape: bf16[16,64], index: 8, kind: output, shape index: {0}]   ;;  %s1620_s9 = inlined_call_operand.hbm [shape: bf16[16,64], index: 9, kind: output, shape index: {1}]   ;;  %s1621_s10 = inlined_call_operand.hbm [shape: bf16[16,32], index: 10, kind: output, shape index: {2}]  }
   0x1   :  { %17 = vsyncpa [#allocation6], 0 }
   0x2   :  { %18 = vsyncpa [#allocation4], 0 }
   0x3   :  { %19 = vsyncpa [#allocation9], 0  ;;  %s1101_s13 = smov [#allocation2]   ;;  %s983_s17 = scalar_lea.hbm %s1613_s2, 512 }
   0x4   :  { %s29_s14 = sshll.u32 %s1101_s13, 4  ;;  %p984_p0 = scmp.ne.s32.totalorder %s1613_s2, %s983_s17  ;;  %s30_s14 = int_to_ptr.vmem [resolvable:$true] %s29_s14 }
   0x5   :  { %p987_p1 = scmp.lt.u32.totalorder %s983_s17, %s1613_s2 }
   0x7   :  { %p989_p2 = pnand %p987_p1, %p984_p0 }
   0x9   :  { %992 = shalt.err (!%p989_p2)
}
   0xa   :  { %s993_s22 = scalar_lea.vmem %s30_s14, 512  ;;  %p998_p4 = scmp.lt.s32.totalorder %s30_s14, %s30_s14 }
   0xb   :  { %p994_p3 = scmp.ne.s32.totalorder %s30_s14, %s993_s22  ;;  %p999_p5 = scmp.lt.s32.totalorder %s993_s22, %s993_s22 }
   0xd   :  { %p1000_p6 = por %p999_p5, %p998_p4 }
   0xf   :  { %p1001_p7 = pnand %p1000_p6, %p994_p3 }
  0x11   :  { %1004 = shalt.err (!%p1001_p7)
}
  0x12   :  { %s1102_s23 = smov 128   ;;  %s1103_s24 = smov 8  }
  0x13   :  { %35 = dma.hbm_to_vmem [thread:$0]  %s1613_s2, 512, %s30_s14, [#allocation3], %s1102_s23, %s1102_s23, %s1103_s24  }
  0x14   :  { %s1104_s27 = smov [#allocation5]   ;;  %s1005_s11 = scalar_lea.hbm %s1617_s6, 256 }
  0x15   :  { %s47_s28 = sshll.u32 %s1104_s27, 4  ;;  %p1006_p8 = scmp.ne.s32.totalorder %s1617_s6, %s1005_s11  ;;  %s48_s28 = int_to_ptr.vmem [resolvable:$true] %s47_s28 }
  0x16   :  { %p1009_p9 = scmp.lt.u32.totalorder %s1005_s11, %s1617_s6 }
  0x18   :  { %p1011_p10 = pnand %p1009_p9, %p1006_p8 }
  0x1a   :  { %1014 = shalt.err (!%p1011_p10)
}
  0x1b   :  { %s1015_s17 = scalar_lea.vmem %s48_s28, 256  ;;  %p1020_p12 = scmp.lt.s32.totalorder %s48_s28, %s48_s28 }
  0x1c   :  { %p1016_p11 = scmp.ne.s32.totalorder %s48_s28, %s1015_s17  ;;  %p1021_p13 = scmp.lt.s32.totalorder %s1015_s17, %s1015_s17 }
  0x1e   :  { %p1022_p0 = por %p1021_p13, %p1020_p12 }
  0x20   :  { %p1023_p1 = pnand %p1022_p0, %p1016_p11 }
  0x22   :  { %1026 = shalt.err (!%p1023_p1)
}
  0x23   :  { %53 = dma.hbm_to_vmem [thread:$0]  %s1617_s6, 256, %s48_s28, [#allocation6], %s1102_s23, %s1102_s23, %s1103_s24  }
  0x24   :  { %1093 = dma.done.wait [#allocation3], 512  }
  0x25   :  { %1094 = vsyncadd [#allocation3], 4294966784 }
  0x26   :  { %1095 = dma.done.wait [#allocation6], 256  }
  0x27   :  { %1096 = vsyncadd [#allocation6], 4294967040  ;;  %vm77_vm0 = vcmask 261120   ;;  %v66_v0 = vld [vmem:[#allocation2] sm:$0xff]  ;;  %v67_v1 = vld [vmem:[#allocation2 + $0x8] sm:$0xff]  ;;  %s1105_s6 = smov 32  }
  0x28   :  { %v68_v2 = vld [vmem:[#allocation2 + $0x10] sm:$0xff]  ;;  %v940_v3 = vpack.c.bf16 %v67_v1, %v66_v0  ;;  %v69_v4 = vld [vmem:[#allocation2 + $0x18] sm:$0xff]  ;;  %v62_v5 = vld [vmem:[%s1611_s0] sm:$0xff]  ;;  %s1106_s27 = smov 36   ;;  %s1107_s28 = smov 12   ;;  %vm220_vm1 = vcmask 130048  }
  0x29   :  { %v944_v6 = vpack.c.bf16 %v69_v4, %v68_v2  ;;  %923 = vmatprep.mubr.msk.f32.mxu0 %vm77_vm0, %v62_v5  ;;  %v1216_v7 = vld [vmem:[%s1612_s1] sm:$0xff]  ;;  %v65_v8 = vld [vmem:[%s1612_s1 + $0x8] sm:$0xff]  ;;  %s1108_s29 = smov 28   ;;  %s1109_s30 = smov 44   ;;  %vm440_vm2 = vcmask 93248   ;;  %vm411_vm3 = vcmask 60416  }
  0x2a   :  { %941 = vmatprep.subr.bf16.mxu0 %v940_v3  ;;  %161 = vrot.lane.b32.xlu1 %v1216_v7, %s1105_s6  ;;  %v63_v9 = vld [vmem:[%s1611_s0 + $0x8] sm:$0xff]  ;;  %s1110_s1 = smov 60   ;;  %s1111_s0 = smov 4   ;;  %v205_v10 = vld [vmem:[%s1615_s4] sm:$0xff]  ;;  %vm481_vm4 = vcmask 126048   ;;  %vm400_vm5 = vcmask 257024  }
  0x2b   :  { %943 = vmatpush3.bf16.msra.mxu0 %v940_v3  ;;  %s1112_s11 = smov 24   ;;  %s1113_s12 = smov 20   ;;  %v206_v11 = vld [vmem:[%s1615_s4 + $0x8] sm:$0xff]  ;;  %v300_v13 = vld [vmem:[#allocation5] sm:$0xff]  ;;  %vm516_vm6 = vcmask 191616   ;;  %vm545_vm7 = vcmask 224448  }
  0x2c   :  { %945 = vmatprep.subr.bf16.mxu0 %v944_v6  ;;  %s1114_s13 = smov 40   ;;  %s1115_s15 = smov 56   ;;  %v948_v12 = vpack.c.bf16 %v206_v11, %v205_v10  ;;  %v301_v14 = vld [vmem:[#allocation5 + $0x8] sm:$0xff]  ;;  %v844_v17 = vld [vmem:[%s1614_s3] ss:$0 sm:$0xff]  ;;  %vm580_vm8 = vcmask 257248  }
  0x2d   :  { %s1116_s16 = smov 52   ;;  %v952_v15 = vpack.c.bf16 %v301_v14, %v300_v13  ;;  %s1117_s4 = smov 112   ;;  %v847_v3 = vld [vmem:[%s1616_s5] ss:$0 sm:$0xff]  ;;  %vm607_vm9 = vcmask 322816   ;;  %vm636_vm10 = vcmask 355648  }
  0x2e   :  { %163 = vrot.lane.b32.xlu1 %v65_v8, %s1105_s6  ;;  %949 = vmatprep.subr.bf16.mxu1 %v948_v12  ;;  %s1118_s21 = smov 124   ;;  %s1119_s3 = smov 120   ;;  %vm671_vm11 = vcmask 388448   ;;  %vm698_vm12 = vcmask 454016   ;;  %vm727_vm13 = vcmask 486848   ;;  %vm768_vm14 = vcmask 519648  }
  0x2f   :  { %947 = vmatpush3.bf16.msra.mxu0 %v944_v6  ;;  %951 = vmatpush3.bf16.msra.mxu1 %v948_v12  ;;  %s1120_s6 = smov 104   ;;  %s1121_s22 = smov 108  }
  0x30   :  { %953 = vmatprep.subr.bf16.mxu1 %v952_v15  ;;  %s1122_s5 = smov 96  }
  0x32   :  { %924 = vmatmul.mubr.msk.f32.vlgmr.msra.gmra.mrb[0].mxu0 %vm77_vm0, %v63_v9  ;;  %189 = vrot.lane.b32.xlu1 %v65_v8, %s1106_s27 }
  0x36   :  { %453 = vrot.lane.b32.xlu1 %v65_v8, %s1107_s28 }
  0x3a   :  { %181 = vrot.lane.b32.xlu1 %v65_v8, %s1108_s29 }
  0x3e   :  { %643 = vrot.lane.b32.xlu1 %v65_v8, %s1109_s30 }
  0x42   :  { %740 = vrot.lane.b32.xlu1 %v65_v8, %s1110_s1 }
  0x46   :  { %416 = vrot.lane.b32.xlu1 %v65_v8, %s1103_s24 }
  0x4a   :  { %445 = vrot.lane.b32.xlu1 %v65_v8, %s1111_s0 }
  0x4e   :  { %521 = vrot.lane.b32.xlu1 %v65_v8, %s1112_s11 }
  0x52   :  { %550 = vrot.lane.b32.xlu1 %v65_v8, %s1113_s12 }
  0x56   :  { %612 = vrot.lane.b32.xlu1 %v65_v8, %s1114_s13 }
  0x5a   :  { %703 = vrot.lane.b32.xlu1 %v65_v8, %s1115_s15 }
  0x5e   :  { %732 = vrot.lane.b32.xlu1 %v65_v8, %s1116_s16 }
  0x9c   :  { %v162_v16 = vpop.permute.xlu1 %161 }
  0xa0   :  { %v164_v18 = vpop.permute.xlu1 %163 }
  0xa4   :  { %v1251_v24 = vpop.permute.xlu1 %189 }
  0xa8   :  { %v1277_v26 = vpop.permute.xlu1 %453 }
  0xac   :  { %v1283_v28 = vpop.permute.xlu1 %181 }
  0xb0   :  { %v1285_v29 = vpop.permute.xlu1 %643 }
  0xb4   :  { %v1287_v30 = vpop.permute.xlu1 %740 }
  0xb8   :  { %v1289_v31 = vpop.permute.xlu1 %416 }
  0xbc   :  { %v1291_v32 = vpop.permute.xlu1 %445 }
  0xc0   :  { %v522_v33 = vpop.permute.xlu1 %521 }
  0xc4   :  { %v1293_v34 = vpop.permute.xlu1 %550 }
  0xc8   :  { %v1295_v35 = vpop.permute.xlu1 %612 }
  0xcc   :  { %v1297_v36 = vpop.permute.xlu1 %703 }
  0xd0   :  { %v1299_v37 = vpop.permute.xlu1 %732 }
 0x105   :  { %v925_v19 = vpop.f32.mrb[0].mxu0 }
 0x106   :  { %v156_v20 = vadd.f32 %v925_v19, %v844_v17  ;;  %v150_v21 = vpop.f32.mrb[1].mxu0 }
 0x107   :  { %v1247_v22 = vadd.f32 %v844_v17, %v150_v21 }
 0x108   :  { %v168_v23 = vmul.f32 %v164_v18, %v156_v20  ;;  %v194_v25 = vmul.f32 %v1251_v24, %v156_v20  ;;  %v186_v46 = vmul.f32 %v1283_v28, %v156_v20 }
 0x109   :  { %216 = vrot.lane.b32.xlu0 %v1247_v22, %s1117_s4  ;;  %v167_v27 = vmul.f32 %v162_v16, %v1247_v22 }
 0x10a   :  { %173 = vrot.lane.b32.xlu1 %v168_v23, %s1118_s21 }
 0x10d   :  { %218 = vrot.lane.b32.xlu0 %v156_v20, %s1117_s4 }
 0x10e   :  { %199 = vrot.lane.b32.xlu1 %v194_v25, %s1118_s21 }
 0x111   :  { %187 = vrot.lane.b32.xlu0 %v1216_v7, %s1106_s27 }
 0x115   :  { %451 = vrot.lane.b32.xlu0 %v1216_v7, %s1107_s28 }
 0x119   :  { %179 = vrot.lane.b32.xlu0 %v1216_v7, %s1108_s29 }
 0x11d   :  { %641 = vrot.lane.b32.xlu0 %v1216_v7, %s1109_s30 }
 0x121   :  { %738 = vrot.lane.b32.xlu0 %v1216_v7, %s1110_s1 }
 0x125   :  { %414 = vrot.lane.b32.xlu0 %v1216_v7, %s1103_s24 }
 0x129   :  { %443 = vrot.lane.b32.xlu0 %v1216_v7, %s1111_s0 }
 0x12d   :  { %519 = vrot.lane.b32.xlu0 %v1216_v7, %s1112_s11 }
 0x131   :  { %548 = vrot.lane.b32.xlu0 %v1216_v7, %s1113_s12 }
 0x135   :  { %610 = vrot.lane.b32.xlu0 %v1216_v7, %s1114_s13 }
 0x139   :  { %701 = vrot.lane.b32.xlu0 %v1216_v7, %s1115_s15 }
 0x13d   :  { %730 = vrot.lane.b32.xlu0 %v1216_v7, %s1116_s16  ;;  %v850_v7 = vld [vmem:[%s1618_s7] ss:$0 sm:$0xff]  ;;  %s1123_s7 = smov 16  }
 0x141   :  { %171 = vrot.lane.b32.xlu0 %v167_v27, %s1118_s21 }
 0x17b   :  { %v217_v38 = vpop.permute.xlu0 %216 }
 0x17c   :  { %v174_v39 = vpop.permute.xlu1 %173  ;;  %930 = vmatprep.mubr.msk.f32.mxu1 %vm220_vm1, %v217_v38 }
 0x17d   :  { %v178_v40 = vsub.f32 %v168_v23, %v174_v39 }
 0x17f   :  { %v1301_v41 = vpack.c.bf16 %v178_v40, %v178_v40  ;;  %v219_v42 = vpop.permute.xlu0 %218 }
 0x180   :  { %931 = vmatmul.mubr.msk.f32.vlgmr.msra.gmra.mrb[0].mxu1 %vm220_vm1, %v219_v42  ;;  %v200_v45 = vpop.permute.xlu1 %199 }
 0x181   :  { %593 = vrot.lane.b32.xlu1 %v1301_v41, %s1119_s3  ;;  %955 = vmatpush3.bf16.msra.mxu1 %v952_v15  ;;  %v204_v48 = vadd.f32 %v200_v45, %v186_v46 }
 0x182   :  { %937 = vmatprep.mubr.msk.f32.mxu1 %vm220_vm1, %v1247_v22 }
 0x183   :  { %v1305_v43 = vpop.permute.xlu0 %187  ;;  %v1312_v50 = vpack.c.bf16 %v204_v48, %v204_v48 }
 0x184   :  { %v193_v44 = vmul.f32 %v1305_v43, %v1247_v22  ;;  %938 = vmatmul.mubr.msk.f32.vlgmr.msra.gmra.mrb[2].mxu1 %vm220_vm1, %v156_v20 }
 0x186   :  { %197 = vrot.lane.b32.xlu0 %v193_v44, %s1118_s21 }
 0x187   :  { %v452_v47 = vpop.permute.xlu0 %451 }
 0x18a   :  { %496 = vrot.lane.b32.xlu0 %v1301_v41, %s1120_s6 }
 0x18b   :  { %v180_v49 = vpop.permute.xlu0 %179 }
 0x18c   :  { %v185_v63 = vmul.f32 %v180_v49, %v1247_v22 }
 0x18e   :  { %510 = vrot.lane.b32.xlu0 %v1312_v50, %s1121_s22 }
 0x18f   :  { %v642_v51 = vpop.permute.xlu0 %641 }
 0x193   :  { %v739_v52 = vpop.permute.xlu0 %738 }
 0x197   :  { %v1315_v53 = vpop.permute.xlu0 %414 }
 0x19b   :  { %v1317_v54 = vpop.permute.xlu0 %443 }
 0x19f   :  { %v1319_v55 = vpop.permute.xlu0 %519 }
 0x1a3   :  { %v1321_v56 = vpop.permute.xlu0 %548 }
 0x1a7   :  { %v1323_v57 = vpop.permute.xlu0 %610 }
 0x1ab   :  { %v1325_v58 = vpop.permute.xlu0 %701 }
 0x1af   :  { %v1327_v59 = vpop.permute.xlu0 %730 }
 0x1b3   :  { %v172_v60 = vpop.permute.xlu0 %171 }
 0x1b4   :  { %v177_v61 = vsub.f32 %v167_v27, %v172_v60 }
 0x1b6   :  { %v1329_v62 = vpack.c.bf16 %v177_v61, %v177_v61 }
 0x1b8   :  { %591 = vrot.lane.b32.xlu0 %v1329_v62, %s1119_s3  ;;  %494 = vrot.lane.b32.xlu1 %v1329_v62, %s1120_s6 }
 0x1f3   :  { %v1352_v15 = vpop.permute.xlu1 %593 }
 0x1f8   :  { %v198_v0 = vpop.permute.xlu0 %197 }
 0x1f9   :  { %v203_v1 = vadd.f32 %v198_v0, %v185_v63 }
 0x1fb   :  { %v887_v2 = vpack.c.bf16 %v203_v1, %v203_v1 }
 0x1fc   :  { %v497_v11 = vpop.permute.xlu0 %496 }
 0x1fd   :  { %508 = vrot.lane.b32.xlu1 %v887_v2, %s1121_s22 }
 0x200   :  { %v511_v21 = vpop.permute.xlu0 %510 }
 0x22a   :  { %v495_v22 = vpop.permute.xlu1 %494 }
 0x253   :  { %v932_v4 = vpop.f32.mrb[0].mxu1 }
 0x254   :  { %v1337_v5 = vadd.f32 %v932_v4, %v847_v3  ;;  %v291_v6 = vpop.f32.mrb[1].mxu1 }
 0x255   :  { %v1342_v8 = vadd.f32 %v847_v3, %v291_v6 }
 0x256   :  { %v1345_v9 = vmul.f32 %v522_v33, %v1337_v5  ;;  %v458_v10 = vmul.f32 %v1277_v26, %v1337_v5  ;;  %v557_v19 = vmul.f32 %v1337_v5, %v1283_v28  ;;  %v1367_v23 = vpack.c.bf16 %v1337_v5, %v1337_v5 }
 0x257   :  { %v939_v12 = vpop.f32.mrb[2].mxu1  ;;  %v457_v18 = vmul.f32 %v452_v47, %v1342_v8  ;;  %v1371_v25 = vpack.c.bf16 %v1342_v8, %v1342_v8  ;;  %v556_v26 = vmul.f32 %v1342_v8, %v180_v49  ;;  %v648_v27 = vmul.f32 %v1285_v29, %v1337_v5 }
 0x258   :  { %v385_v13 = vadd.f32 %v939_v12, %v850_v7  ;;  %v379_v14 = vpop.f32.mrb[3].mxu1  ;;  %531 = vrot.lane.b32.xlu0 %v1345_v9, %s1118_s21  ;;  %463 = vrot.lane.b32.xlu1 %v458_v10, %s1118_s21  ;;  %413 = vst.msk [vmem:[#allocation7 + $0x4] sm:$0xf] %vm411_vm3, %v1367_v23  ;;  %v647_v28 = vmul.f32 %v642_v51, %v1342_v8 }
 0x259   :  { %v380_v16 = vadd.f32 %v850_v7, %v379_v14  ;;  %412 = vst.msk [vmem:[#allocation7] sm:$0xf] %vm411_vm3, %v1371_v25  ;;  %v745_v33 = vmul.f32 %v1287_v30, %v1337_v5  ;;  %v744_v29 = vmul.f32 %v739_v52, %v1342_v8  ;;  %v1392_v38 = vmul.f32 %v1289_v31, %v1337_v5 }
 0x25a   :  { %v1354_v17 = vpack.c.bf16 %v385_v13, %v385_v13  ;;  %v1399_v39 = vmul.f32 %v1295_v35, %v1337_v5  ;;  %v1414_v31 = vmul.f32 %v1297_v36, %v1337_v5  ;;  %v1425_v35 = vmul.f32 %v1315_v53, %v1342_v8 }
 0x25b   :  { %v877_v20 = vpack.c.bf16 %v380_v16, %v380_v16  ;;  %v1433_v36 = vmul.f32 %v1323_v57, %v1342_v8  ;;  %v1441_v40 = vmul.f32 %v1325_v58, %v1342_v8  ;;  %v1445_v42 = vmul.f32 %v1319_v55, %v1342_v8 }
 0x25c   :  { %487 = vst.msk [vmem:[#allocation8 + $0x4] sm:$0xf] %vm411_vm3, %v1354_v17  ;;  %461 = vrot.lane.b32.xlu0 %v457_v18, %s1118_s21  ;;  %562 = vrot.lane.b32.xlu1 %v557_v19, %s1118_s21  ;;  %v450_v44 = vmul.f32 %v1291_v32, %v1337_v5  ;;  %v555_v49 = vmul.f32 %v1293_v34, %v1337_v5 }
 0x25d   :  { %486 = vst.msk [vmem:[#allocation8] sm:$0xf] %vm411_vm3, %v877_v20  ;;  %v640_v32 = vmul.f32 %v1337_v5, %v1251_v24  ;;  %v554_v60 = vmul.f32 %v1321_v56, %v1342_v8  ;;  %v737_v1 = vmul.f32 %v1299_v37, %v1337_v5  ;;  %v736_v10 = vmul.f32 %v1327_v59, %v1342_v8 }
 0x25e   :  { %501 = vst.msk [vmem:[#allocation8 + $0x4] sm:$0xf] %vm440_vm2, %v497_v11  ;;  %500 = vst.msk [vmem:[#allocation8] sm:$0xf] %vm440_vm2, %v495_v22 }
 0x25f   :  { %515 = vst.msk [vmem:[#allocation8 + $0x4] sm:$0xf] %vm481_vm4, %v511_v21 }
 0x260   :  { %560 = vrot.lane.b32.xlu0 %v556_v26, %s1118_s21  ;;  %653 = vrot.lane.b32.xlu1 %v648_v27, %s1118_s21 }
 0x264   :  { %651 = vrot.lane.b32.xlu0 %v647_v28, %s1118_s21  ;;  %750 = vrot.lane.b32.xlu1 %v745_v33, %s1118_s21 }
 0x268   :  { %748 = vrot.lane.b32.xlu0 %v744_v29, %s1118_s21  ;;  %426 = vrot.lane.b32.xlu1 %v1392_v38, %s1118_s21 }
 0x26c   :  { %599 = vrot.lane.b32.xlu0 %v887_v2, %s1118_s21  ;;  %622 = vrot.lane.b32.xlu1 %v1399_v39, %s1118_s21 }
 0x26f   :  { %v509_v30 = vpop.permute.xlu1 %508 }
 0x270   :  { %514 = vst.msk [vmem:[#allocation8] sm:$0xf] %vm481_vm4, %v509_v30  ;;  %682 = vrot.lane.b32.xlu0 %v1329_v62, %s1103_s24  ;;  %601 = vrot.lane.b32.xlu1 %v1312_v50, %s1118_s21 }
 0x274   :  { %690 = vrot.lane.b32.xlu0 %v887_v2, %s1107_s28  ;;  %684 = vrot.lane.b32.xlu1 %v1301_v41, %s1103_s24 }
 0x278   :  { %779 = vrot.lane.b32.xlu0 %v1329_v62, %s1112_s11  ;;  %713 = vrot.lane.b32.xlu1 %v1414_v31, %s1118_s21 }
 0x27c   :  { %787 = vrot.lane.b32.xlu0 %v887_v2, %s1108_s29  ;;  %692 = vrot.lane.b32.xlu1 %v1312_v50, %s1107_s28  ;;  %v639_v2 = vmul.f32 %v1342_v8, %v1305_v43 }
 0x280   :  { %424 = vrot.lane.b32.xlu0 %v1425_v35, %s1118_s21  ;;  %781 = vrot.lane.b32.xlu1 %v1301_v41, %s1112_s11  ;;  %v1459_v41 = vpop.permute.xlu0 %591 }
 0x284   :  { %620 = vrot.lane.b32.xlu0 %v1433_v36, %s1118_s21  ;;  %789 = vrot.lane.b32.xlu1 %v1312_v50, %s1108_s29  ;;  %v449_v50 = vmul.f32 %v1317_v54, %v1342_v8  ;;  %s1125_s29 = smov [#allocation10]  }
 0x285   :  { %s824_s30 = sshll.u32 %s1125_s29, 4  ;;  %s1519_s30 = int_to_ptr.vmem [resolvable:$true] %s824_s30 }
 0x288   :  { %711 = vrot.lane.b32.xlu0 %v1441_v40, %s1118_s21  ;;  %529 = vrot.lane.b32.xlu1 %v1445_v42, %s1118_s21 }
 0x28c   :  { %394 = vrot.lane.b32.xlu0 %v877_v20, %s1122_s5  ;;  %396 = vrot.lane.b32.xlu1 %v1354_v17, %s1122_s5 }
 0x290   :  { %583 = vrot.lane.b32.xlu0 %v877_v20, %s1103_s24  ;;  %585 = vrot.lane.b32.xlu1 %v1354_v17, %s1103_s24  ;;  %s1124_s24 = smov [#allocation8]  }
 0x291   :  { %s812_s28 = sshll.u32 %s1124_s24, 4  ;;  %s813_s28 = int_to_ptr.vmem [resolvable:$true] %s812_s28 }
 0x292   :  { %s1027_s1 = scalar_lea.vmem %s813_s28, 128  ;;  %p1032_p3 = scmp.lt.s32.totalorder %s813_s28, %s813_s28 }
 0x293   :  { %p1028_p2 = scmp.ne.s32.totalorder %s813_s28, %s1027_s1  ;;  %p1033_p4 = scmp.lt.s32.totalorder %s1027_s1, %s1027_s1 }
 0x294   :  { %674 = vrot.lane.b32.xlu0 %v877_v20, %s1123_s7  ;;  %676 = vrot.lane.b32.xlu1 %v1354_v17, %s1123_s7 }
 0x295   :  { %p1034_p5 = por %p1033_p4, %p1032_p3 }
 0x297   :  { %p1035_p6 = pnand %p1034_p5, %p1028_p2 }
 0x298   :  { %771 = vrot.lane.b32.xlu0 %v877_v20, %s1112_s11  ;;  %773 = vrot.lane.b32.xlu1 %v1354_v17, %s1112_s11 }
 0x2ca   :  { %v464_v45 = vpop.permute.xlu1 %463  ;;  %v1463_v46 = vpop.permute.xlu0 %531 }
 0x2cb   :  { %v468_v47 = vadd.f32 %v464_v45, %v450_v44 }
 0x2cd   :  { %v884_v48 = vpack.c.bf16 %v468_v47, %v468_v47 }
 0x2ce   :  { %v563_v51 = vpop.permute.xlu1 %562  ;;  %v462_v52 = vpop.permute.xlu0 %461 }
 0x2cf   :  { %v567_v53 = vadd.f32 %v563_v51, %v555_v49  ;;  %v467_v55 = vadd.f32 %v462_v52, %v449_v50  ;;  %477 = vrot.lane.b32.xlu1 %v884_v48, %s1111_s0 }
 0x2d1   :  { %v892_v57 = vpack.c.bf16 %v567_v53, %v567_v53  ;;  %v883_v58 = vpack.c.bf16 %v467_v55, %v467_v55 }
 0x2d2   :  { %v654_v61 = vpop.permute.xlu1 %653  ;;  %v561_v62 = vpop.permute.xlu0 %560 }
 0x2d3   :  { %v658_v34 = vadd.f32 %v654_v61, %v640_v32  ;;  %v566_v63 = vadd.f32 %v561_v62, %v554_v60  ;;  %576 = vrot.lane.b32.xlu1 %v892_v57, %s1111_s0  ;;  %475 = vrot.lane.b32.xlu0 %v883_v58, %s1111_s0 }
 0x2d5   :  { %v896_v54 = vpack.c.bf16 %v658_v34, %v658_v34  ;;  %v891_v0 = vpack.c.bf16 %v566_v63, %v566_v63 }
 0x2d6   :  { %v751_v24 = vpop.permute.xlu1 %750  ;;  %v652_v3 = vpop.permute.xlu0 %651 }
 0x2d7   :  { %v755_v4 = vadd.f32 %v751_v24, %v737_v1  ;;  %v657_v56 = vadd.f32 %v652_v3, %v639_v2  ;;  %667 = vrot.lane.b32.xlu1 %v896_v54, %s1111_s0  ;;  %574 = vrot.lane.b32.xlu0 %v891_v0, %s1111_s0 }
 0x2d9   :  { %v900_v6 = vpack.c.bf16 %v755_v4, %v755_v4  ;;  %v895_v7 = vpack.c.bf16 %v657_v56, %v657_v56 }
 0x2da   :  { %v427_v11 = vpop.permute.xlu1 %426  ;;  %v749_v12 = vpop.permute.xlu0 %748 }
 0x2db   :  { %v431_v37 = vsub.f32 %v1392_v38, %v427_v11  ;;  %v754_v5 = vadd.f32 %v749_v12, %v736_v10  ;;  %764 = vrot.lane.b32.xlu1 %v900_v6, %s1111_s0  ;;  %665 = vrot.lane.b32.xlu0 %v895_v7, %s1111_s0 }
 0x2dd   :  { %v882_v43 = vpack.c.bf16 %v431_v37, %v431_v37  ;;  %v899_v13 = vpack.c.bf16 %v754_v5, %v754_v5 }
 0x2de   :  { %v1487_v14 = vpop.permute.xlu1 %622  ;;  %v600_v16 = vpop.permute.xlu0 %599 }
 0x2df   :  { %762 = vrot.lane.b32.xlu0 %v899_v13, %s1111_s0  ;;  %442 = vst.msk [vmem:[#allocation7 + $0x4] sm:$0xf] %vm440_vm2, %v882_v43 }
 0x2e2   :  { %v602_v17 = vpop.permute.xlu1 %601  ;;  %v683_v59 = vpop.permute.xlu0 %682 }
 0x2e6   :  { %v685_v8 = vpop.permute.xlu1 %684  ;;  %v691_v18 = vpop.permute.xlu0 %690 }
 0x2ea   :  { %v1491_v19 = vpop.permute.xlu1 %713  ;;  %v780_v20 = vpop.permute.xlu0 %779 }
 0x2ee   :  { %v693_v21 = vpop.permute.xlu1 %692  ;;  %v788_v22 = vpop.permute.xlu0 %787 }
 0x2f2   :  { %v782_v26 = vpop.permute.xlu1 %781  ;;  %v425_v27 = vpop.permute.xlu0 %424 }
 0x2f3   :  { %v430_v28 = vsub.f32 %v1425_v35, %v425_v27 }
 0x2f5   :  { %v881_v33 = vpack.c.bf16 %v430_v28, %v430_v28 }
 0x2f6   :  { %v790_v29 = vpop.permute.xlu1 %789  ;;  %v1494_v38 = vpop.permute.xlu0 %620 }
 0x2f7   :  { %441 = vst.msk [vmem:[#allocation7] sm:$0xf] %vm440_vm2, %v881_v33 }
 0x2fa   :  { %v1497_v30 = vpop.permute.xlu1 %529  ;;  %v1499_v44 = vpop.permute.xlu0 %711 }
 0x2fe   :  { %v397_v45 = vpop.permute.xlu1 %396  ;;  %v395_v47 = vpop.permute.xlu0 %394 }
 0x2ff   :  { %402 = vst.msk [vmem:[#allocation10 + $0x4] sm:$0xf] %vm400_vm5, %v397_v45  ;;  %401 = vst.msk [vmem:[#allocation10] sm:$0xf] %vm400_vm5, %v395_v47 }
 0x302   :  { %v586_v48 = vpop.permute.xlu1 %585  ;;  %v584_v49 = vpop.permute.xlu0 %583 }
 0x303   :  { %590 = vst.msk [vmem:[#allocation8 + $0x4] sm:$0xf] %vm516_vm6, %v586_v48  ;;  %589 = vst.msk [vmem:[#allocation8] sm:$0xf] %vm516_vm6, %v584_v49 }
 0x304   :  { %598 = vst.msk [vmem:[#allocation8 + $0x4] sm:$0xf] %vm545_vm7, %v1352_v15  ;;  %597 = vst.msk [vmem:[#allocation8] sm:$0xf] %vm545_vm7, %v1459_v41 }
 0x305   :  { %606 = vst.msk [vmem:[#allocation8 + $0x4] sm:$0xf] %vm580_vm8, %v602_v17  ;;  %605 = vst.msk [vmem:[#allocation8] sm:$0xf] %vm580_vm8, %v600_v16 }
 0x306   :  { %v677_v35 = vpop.permute.xlu1 %676  ;;  %v675_v50 = vpop.permute.xlu0 %674 }
 0x307   :  { %681 = vst.msk [vmem:[#allocation8 + $0x4] sm:$0xf] %vm607_vm9, %v677_v35  ;;  %680 = vst.msk [vmem:[#allocation8] sm:$0xf] %vm607_vm9, %v675_v50 }
 0x308   :  { %689 = vst.msk [vmem:[#allocation8 + $0x4] sm:$0xf] %vm636_vm10, %v685_v8  ;;  %688 = vst.msk [vmem:[#allocation8] sm:$0xf] %vm636_vm10, %v683_v59 }
 0x309   :  { %697 = vst.msk [vmem:[#allocation8 + $0x4] sm:$0xf] %vm671_vm11, %v693_v21  ;;  %696 = vst.msk [vmem:[#allocation8] sm:$0xf] %vm671_vm11, %v691_v18 }
 0x30a   :  { %v774_v15 = vpop.permute.xlu1 %773  ;;  %v772_v41 = vpop.permute.xlu0 %771 }
 0x30b   :  { %778 = vst.msk [vmem:[#allocation8 + $0x4] sm:$0xf] %vm698_vm12, %v774_v15  ;;  %777 = vst.msk [vmem:[#allocation8] sm:$0xf] %vm698_vm12, %v772_v41 }
 0x30c   :  { %786 = vst.msk [vmem:[#allocation8 + $0x4] sm:$0xf] %vm727_vm13, %v782_v26  ;;  %785 = vst.msk [vmem:[#allocation8] sm:$0xf] %vm727_vm13, %v780_v20 }
 0x30d   :  { %793 = vst.msk [vmem:[#allocation8] sm:$0xf] %vm768_vm14, %v788_v22  ;;  %794 = vst.msk [vmem:[#allocation8 + $0x4] sm:$0xf] %vm768_vm14, %v790_v29 }
 0x30e   :  { %1038 = shalt.err (!%p1035_p6)
}
 0x30f   :  { %s1039_s13 = scalar_lea.hbm %s1620_s9, 128 }
 0x310   :  { %p1040_p7 = scmp.ne.s32.totalorder %s1620_s9, %s1039_s13  ;;  %p1043_p8 = scmp.lt.u32.totalorder %s1039_s13, %s1620_s9 }
 0x312   :  { %p1045_p9 = pnand %p1043_p8, %p1040_p7 }
 0x314   :  { %1048 = shalt.err (!%p1045_p9)
}
 0x315   :  { %s1126_s14 = smov 64   ;;  %s1049_s20 = scalar_lea.vmem %s1519_s30, 128 }
 0x316   :  { %818 = dma.vmem_to_hbm [thread:$0]  %s813_s28, 128, %s1620_s9, [#allocation9], %s1126_s14, %s1126_s14, %s1111_s0  }
 0x317   :  { %p1050_p10 = scmp.ne.s32.totalorder %s1519_s30, %s1049_s20  ;;  %p1054_p11 = scmp.lt.s32.totalorder %s1519_s30, %s1519_s30 }
 0x318   :  { %p1055_p12 = scmp.lt.s32.totalorder %s1049_s20, %s1049_s20 }
 0x31a   :  { %p1056_p13 = por %p1055_p12, %p1054_p11 }
 0x31c   :  { %p1057_p0 = pnand %p1056_p13, %p1050_p10 }
 0x31e   :  { %1060 = shalt.err (!%p1057_p0)
}
 0x31f   :  { %s1061_s3 = scalar_lea.hbm %s1621_s10, 128 }
 0x320   :  { %p1062_p1 = scmp.ne.s32.totalorder %s1621_s10, %s1061_s3  ;;  %p1065_p2 = scmp.lt.u32.totalorder %s1061_s3, %s1621_s10 }
 0x322   :  { %p1067_p3 = pnand %p1065_p2, %p1062_p1 }
 0x324   :  { %1070 = shalt.err (!%p1067_p3)
}
 0x325   :  { %830 = dma.vmem_to_hbm [thread:$0]  %s1519_s30, 128, %s1621_s10, [#allocation9], %s1126_s14, %s1126_s14, %s1111_s0   ;;  %v536_v51 = vsub.f32 %v1345_v9, %v1463_v46  ;;  %v627_v55 = vsub.f32 %v1399_v39, %v1487_v14  ;;  %v535_v57 = vsub.f32 %v1445_v42, %v1497_v30  ;;  %v718_v9 = vsub.f32 %v1414_v31, %v1491_v19 }
 0x326   :  { %v626_v46 = vsub.f32 %v1433_v36, %v1494_v38  ;;  %v717_v36 = vsub.f32 %v1441_v40, %v1499_v44  ;;  %s1127_s10 = smov [#allocation7]  }
 0x327   :  { %v890_v53 = vpack.c.bf16 %v536_v51, %v536_v51  ;;  %v894_v60 = vpack.c.bf16 %v627_v55, %v627_v55  ;;  %v889_v39 = vpack.c.bf16 %v535_v57, %v535_v57  ;;  %v898_v61 = vpack.c.bf16 %v718_v9, %v718_v9  ;;  %s800_s27 = sshll.u32 %s1127_s10, 4  ;;  %s801_s27 = int_to_ptr.vmem [resolvable:$true] %s800_s27 }
 0x328   :  { %v893_v62 = vpack.c.bf16 %v626_v46, %v626_v46  ;;  %v897_v54 = vpack.c.bf16 %v717_v36, %v717_v36  ;;  %s1071_s5 = scalar_lea.vmem %s801_s27, 128  ;;  %p1076_p5 = scmp.lt.s32.totalorder %s801_s27, %s801_s27 }
 0x329   :  { %p1072_p4 = scmp.ne.s32.totalorder %s801_s27, %s1071_s5  ;;  %p1077_p6 = scmp.lt.s32.totalorder %s1071_s5, %s1071_s5 }
 0x32b   :  { %p1078_p7 = por %p1077_p6, %p1076_p5 }
 0x32d   :  { %p1079_p8 = pnand %p1078_p7, %p1072_p4 }
 0x341   :  { %v478_v52 = vpop.permute.xlu1 %477 }
 0x342   :  { %483 = vst.msk [vmem:[#allocation7 + $0x4] sm:$0xf] %vm481_vm4, %v478_v52 }
 0x343   :  { %518 = vst.msk [vmem:[#allocation7 + $0x4] sm:$0xf] %vm516_vm6, %v1367_v23 }
 0x344   :  { %547 = vst.msk [vmem:[#allocation7 + $0x4] sm:$0xf] %vm545_vm7, %v890_v53 }
 0x345   :  { %v577_v58 = vpop.permute.xlu1 %576  ;;  %v476_v32 = vpop.permute.xlu0 %475 }
 0x346   :  { %582 = vst.msk [vmem:[#allocation7 + $0x4] sm:$0xf] %vm580_vm8, %v577_v58 }
 0x347   :  { %482 = vst.msk [vmem:[#allocation7] sm:$0xf] %vm481_vm4, %v476_v32 }
 0x348   :  { %609 = vst.msk [vmem:[#allocation7 + $0x4] sm:$0xf] %vm607_vm9, %v1367_v23 }
 0x349   :  { %517 = vst.msk [vmem:[#allocation7] sm:$0xf] %vm516_vm6, %v1371_v25  ;;  %v668_v42 = vpop.permute.xlu1 %667  ;;  %v575_v31 = vpop.permute.xlu0 %574 }
 0x34a   :  { %638 = vst.msk [vmem:[#allocation7 + $0x4] sm:$0xf] %vm636_vm10, %v894_v60 }
 0x34b   :  { %546 = vst.msk [vmem:[#allocation7] sm:$0xf] %vm545_vm7, %v889_v39 }
 0x34c   :  { %673 = vst.msk [vmem:[#allocation7 + $0x4] sm:$0xf] %vm671_vm11, %v668_v42 }
 0x34d   :  { %581 = vst.msk [vmem:[#allocation7] sm:$0xf] %vm580_vm8, %v575_v31  ;;  %v765_v34 = vpop.permute.xlu1 %764  ;;  %v666_v63 = vpop.permute.xlu0 %665 }
 0x34e   :  { %700 = vst.msk [vmem:[#allocation7 + $0x4] sm:$0xf] %vm698_vm12, %v1367_v23 }
 0x34f   :  { %608 = vst.msk [vmem:[#allocation7] sm:$0xf] %vm607_vm9, %v1371_v25 }
 0x350   :  { %729 = vst.msk [vmem:[#allocation7 + $0x4] sm:$0xf] %vm727_vm13, %v898_v61 }
 0x351   :  { %637 = vst.msk [vmem:[#allocation7] sm:$0xf] %vm636_vm10, %v893_v62  ;;  %v763_v23 = vpop.permute.xlu0 %762 }
 0x352   :  { %770 = vst.msk [vmem:[#allocation7 + $0x4] sm:$0xf] %vm768_vm14, %v765_v34 }
 0x353   :  { %672 = vst.msk [vmem:[#allocation7] sm:$0xf] %vm671_vm11, %v666_v63 }
 0x354   :  { %699 = vst.msk [vmem:[#allocation7] sm:$0xf] %vm698_vm12, %v1371_v25 }
 0x355   :  { %728 = vst.msk [vmem:[#allocation7] sm:$0xf] %vm727_vm13, %v897_v54 }
 0x356   :  { %769 = vst.msk [vmem:[#allocation7] sm:$0xf] %vm768_vm14, %v763_v23 }
 0x357   :  { %1082 = shalt.err (!%p1079_p8)
}
 0x358   :  { %s1083_s28 = scalar_lea.hbm %s1619_s8, 128 }
 0x359   :  { %p1084_p9 = scmp.ne.s32.totalorder %s1619_s8, %s1083_s28  ;;  %p1087_p10 = scmp.lt.u32.totalorder %s1083_s28, %s1619_s8 }
 0x35b   :  { %p1089_p11 = pnand %p1087_p10, %p1084_p9 }
 0x35d   :  { %1092 = shalt.err (!%p1089_p11)
}
 0x35e   :  { %806 = dma.vmem_to_hbm [thread:$0]  %s801_s27, 128, %s1619_s8, [#allocation4], %s1126_s14, %s1126_s14, %s1111_s0  }
 0x35f   :  { %1097 = dma.done.wait [#allocation4], 128  }
 0x360   :  { %1098 = vsyncadd [#allocation4], 4294967168 }
 0x361   :  { %1099 = dma.done.wait [#allocation9], 256  }
 0x362   :  { %1100 = vsyncadd [#allocation9], 4294967040 }
 0x363   :  { %840 = vsyncpa [#allocation3], 1 }
 0x364   :  { %841 = vsyncpa [#allocation6], 1 }
 0x365   :  { %842 = vsyncpa [#allocation4], 1 }
 0x366   :  { %843 = vsyncpa [#allocation9], 1 }

</bundles_post_ra>
